<compile_context>
chip_gen: v5e
topology: v5e:2x2
jax: 0.10.0
libtpu: 0.0.40
codegen_flags: <defaults>
</compile_context>

<pallas_src>
import jax
import jax.numpy as jnp
from jax.experimental import pallas as pl
from jax.experimental.pallas import tpu as pltpu


HIDDEN = 128
COMPUTE_DTYPE = jnp.bfloat16  # operand dtype for the MXU dots


def pd_critic_kernel(x_ref, w1_ref, b1_ref, w2_ref, b2_ref, w3_ref, b3_ref,
                     o_ref):
    # Transposed layout: x_ref is [obs_dim, TB], weights are [out, in],
    # biases are [out, 1] (f32), output tile is [action_dim, TB] (f32).
    obs_dim = x_ref.shape[0]
    x = x_ref[...]

    # ---- fc1 + relu ----
    if obs_dim <= 8:
        # K is tiny: a VPU broadcast-FMA chain beats an MXU matmul that pads
        # K up to 128/256.  Keep the elementwise math in f32 (v5e VPU has no
        # bf16 path).
        xf = x.astype(jnp.float32)
        wf = w1_ref[...].astype(jnp.float32)
        h1 = b1_ref[...] + wf[:, 0:1] * xf[0:1, :]
        for k in range(1, obs_dim):
            h1 = h1 + wf[:, k:k + 1] * xf[k:k + 1, :]
    else:
        h1 = jnp.dot(w1_ref[...], x,
                     preferred_element_type=jnp.float32) + b1_ref[...]
    h1 = jnp.maximum(h1, 0.0)

    # ---- fc2 + relu ----  (bf16 operands on the MXU, f32 accumulation)
    h2 = jnp.dot(w2_ref[...], h1.astype(w2_ref.dtype),
                 preferred_element_type=jnp.float32) + b2_ref[...]
    h2 = jnp.maximum(h2, 0.0)

    # ---- fc3 (no activation) ----
    out = jnp.dot(w3_ref[...], h2.astype(w3_ref.dtype),
                  preferred_element_type=jnp.float32) + b3_ref[...]
    o_ref[...] = out.astype(o_ref.dtype)


def pd_critic_forward(x, params, *, tb=512, compute_dtype=COMPUTE_DTYPE):
    """x: [B, obs_dim] float32.  params: PyTorch-layout dict
    (w: [out, in], b: [out, 1]).  Returns [B, action_dim] float32."""
    B, obs_dim = x.shape
    hidden = params["w1"].shape[0]
    action_dim = params["w3"].shape[0]

    # Lane-dense batch tiling: pad B up to a multiple of 128 and pick a
    # batch tile TB (multiple of 128) that divides the padded batch.
    b_pad = pl.cdiv(max(B, 128), 128) * 128
    tb = max(128, (min(tb, b_pad) // 128) * 128)
    b_pad = pl.cdiv(b_pad, tb) * tb

    # Transpose so batch sits on the lane axis; pad with zeros (sliced off
    # after the call, so they never affect real outputs).
    x_t = jnp.pad(x.T.astype(compute_dtype), ((0, 0), (0, b_pad - B)))

    w1 = params["w1"].astype(compute_dtype)
    w2 = params["w2"].astype(compute_dtype)
    w3 = params["w3"].astype(compute_dtype)
    b1 = params["b1"].astype(jnp.float32)
    b2 = params["b2"].astype(jnp.float32)
    b3 = params["b3"].astype(jnp.float32)

    grid = (b_pad // tb,)
    out_t = pl.pallas_call(
        pd_critic_kernel,
        out_shape=jax.ShapeDtypeStruct((action_dim, b_pad), jnp.float32),
        grid=grid,
        in_specs=[
            pl.BlockSpec((obs_dim, tb), lambda i: (0, i)),       # x tile
            pl.BlockSpec((hidden, obs_dim), lambda i: (0, 0)),   # w1 resident
            pl.BlockSpec((hidden, 1), lambda i: (0, 0)),         # b1
            pl.BlockSpec((hidden, hidden), lambda i: (0, 0)),    # w2
            pl.BlockSpec((hidden, 1), lambda i: (0, 0)),         # b2
            pl.BlockSpec((action_dim, hidden), lambda i: (0, 0)),  # w3
            pl.BlockSpec((action_dim, 1), lambda i: (0, 0)),     # b3
        ],
        out_specs=pl.BlockSpec((action_dim, tb), lambda i: (0, i)),
        compiler_params=pltpu.CompilerParams(
            dimension_semantics=("parallel",)),  # megacore split on v7x
    )(x_t, w1, b1, w2, b2, w3, b3)

    return out_t[:, :B].T.astype(x.dtype)


def init_params(key, obs_dim, action_dim, hidden=HIDDEN):
    """Deterministic synthetic init, PyTorch nn.Linear layout and bounds."""
    ks = jax.random.split(key, 6)

    def linear(kw, kb, fan_in, fan_out):
        bound = 1.0 / jnp.sqrt(float(fan_in))
        w = jax.random.uniform(kw, (fan_out, fan_in), jnp.float32,
                               minval=-bound, maxval=bound)
        b = jax.random.uniform(kb, (fan_out, 1), jnp.float32,
                               minval=-bound, maxval=bound)
        return w, b

    w1, b1 = linear(ks[0], ks[1], obs_dim, hidden)
    w2, b2 = linear(ks[2], ks[3], hidden, hidden)
    w3, b3 = linear(ks[4], ks[5], hidden, action_dim)
    return {"w1": w1, "b1": b1, "w2": w2, "b2": b2, "w3": w3, "b3": b3}


def ref_forward(x, params, compute_dtype=COMPUTE_DTYPE):
    """Plain-JAX reference using the same bf16 operand / f32 accumulate path."""
    cd = compute_dtype
    w1 = params["w1"].astype(cd)
    w2 = params["w2"].astype(cd)
    w3 = params["w3"].astype(cd)
    b1 = params["b1"].astype(jnp.float32)
    b2 = params["b2"].astype(jnp.float32)
    b3 = params["b3"].astype(jnp.float32)
    h = jnp.dot(x.astype(cd), w1.T, preferred_element_type=jnp.float32) + b1.T
    h = jnp.maximum(h, 0.0)
    h = jnp.dot(h.astype(cd), w2.T, preferred_element_type=jnp.float32) + b2.T
    h = jnp.maximum(h, 0.0)
    return jnp.dot(h.astype(cd), w3.T, preferred_element_type=jnp.float32) + b3.T


if __name__ == "__main__":
    # CartPole-like dims.  batch=200 (not a multiple of 128) exercises the
    # padding path; tb=128 gives a 2-step batch grid.
    obs_dim, action_dim, batch = 4, 2, 200

    key = jax.random.PRNGKey(0)
    k_params, k_x = jax.random.split(key)
    params = init_params(k_params, obs_dim, action_dim)
    x = jax.random.normal(k_x, (batch, obs_dim), jnp.float32)

    out = pd_critic_forward(x, params, tb=128)
    out = jax.block_until_ready(out)

    ref = ref_forward(x, params)
    assert out.shape == (batch, action_dim)
    assert jnp.allclose(out, ref, atol=5e-3, rtol=5e-3), \
        float(jnp.max(jnp.abs(out - ref)))

    print("KERNEL_OK")
</pallas_src>

<mosaic_0001>
module attributes {stable_mosaic.version = 11 : i64} {
  func.func @pd_critic_kernel(%arg0: i32, %arg1: memref<4x128xbf16, #tpu.memory_space<vmem>>, %arg2: memref<128x4xbf16, #tpu.memory_space<vmem>>, %arg3: memref<128x1xf32, #tpu.memory_space<vmem>>, %arg4: memref<128x128xbf16, #tpu.memory_space<vmem>>, %arg5: memref<128x1xf32, #tpu.memory_space<vmem>>, %arg6: memref<2x128xbf16, #tpu.memory_space<vmem>>, %arg7: memref<2x1xf32, #tpu.memory_space<vmem>>, %arg8: memref<2x128xf32, #tpu.memory_space<vmem>>) attributes {dimension_semantics = [#tpu.dimension_semantics<parallel>], iteration_bounds = array<i64: 2>, scalar_prefetch = 0 : i64, scratch_operands = 0 : i64, tpu.core_type = #tpu.core_type<tc>, window_params = [{transform_indices = @transform_0, window_bounds = array<i64: 4, 128>}, {pipeline_mode = #tpu.pipeline_mode<synchronous>, transform_indices = @transform_1, window_bounds = array<i64: 128, 4>}, {pipeline_mode = #tpu.pipeline_mode<synchronous>, transform_indices = @transform_2, window_bounds = array<i64: 128, 1>}, {pipeline_mode = #tpu.pipeline_mode<synchronous>, transform_indices = @transform_3, window_bounds = array<i64: 128, 128>}, {pipeline_mode = #tpu.pipeline_mode<synchronous>, transform_indices = @transform_4, window_bounds = array<i64: 128, 1>}, {pipeline_mode = #tpu.pipeline_mode<synchronous>, transform_indices = @transform_5, window_bounds = array<i64: 2, 128>}, {pipeline_mode = #tpu.pipeline_mode<synchronous>, transform_indices = @transform_6, window_bounds = array<i64: 2, 1>}, {transform_indices = @transform_7, window_bounds = array<i64: 2, 128>}]} {
    %c0 = arith.constant 0 : index
    %c0_0 = arith.constant 0 : index
    %0 = vector.load %arg1[%c0, %c0_0] : memref<4x128xbf16, #tpu.memory_space<vmem>>, vector<4x128xbf16>
    %1 = arith.extf %0 : vector<4x128xbf16> to vector<4x128xf32>
    %c0_1 = arith.constant 0 : index
    %c0_2 = arith.constant 0 : index
    %2 = vector.load %arg2[%c0_1, %c0_2] : memref<128x4xbf16, #tpu.memory_space<vmem>>, vector<128x4xbf16>
    %3 = arith.extf %2 : vector<128x4xbf16> to vector<128x4xf32>
    %c0_3 = arith.constant 0 : index
    %c0_4 = arith.constant 0 : index
    %4 = vector.load %arg3[%c0_3, %c0_4] : memref<128x1xf32, #tpu.memory_space<vmem>>, vector<128x1xf32>
    %5 = vector.extract_strided_slice %3 {offsets = [0, 0], sizes = [128, 1], strides = [1, 1]} : vector<128x4xf32> to vector<128x1xf32>
    %6 = vector.extract_strided_slice %1 {offsets = [0, 0], sizes = [1, 128], strides = [1, 1]} : vector<4x128xf32> to vector<1x128xf32>
    %7 = vector.broadcast %5 : vector<128x1xf32> to vector<128x128xf32>
    %8 = vector.broadcast %6 : vector<1x128xf32> to vector<128x128xf32>
    %9 = arith.mulf %7, %8 : vector<128x128xf32>
    %10 = vector.broadcast %4 : vector<128x1xf32> to vector<128x128xf32>
    %11 = arith.addf %10, %9 : vector<128x128xf32>
    %12 = vector.extract_strided_slice %3 {offsets = [0, 1], sizes = [128, 1], strides = [1, 1]} : vector<128x4xf32> to vector<128x1xf32>
    %13 = vector.extract_strided_slice %1 {offsets = [1, 0], sizes = [1, 128], strides = [1, 1]} : vector<4x128xf32> to vector<1x128xf32>
    %14 = vector.broadcast %12 : vector<128x1xf32> to vector<128x128xf32>
    %15 = vector.broadcast %13 : vector<1x128xf32> to vector<128x128xf32>
    %16 = arith.mulf %14, %15 : vector<128x128xf32>
    %17 = arith.addf %11, %16 : vector<128x128xf32>
    %18 = vector.extract_strided_slice %3 {offsets = [0, 2], sizes = [128, 1], strides = [1, 1]} : vector<128x4xf32> to vector<128x1xf32>
    %19 = vector.extract_strided_slice %1 {offsets = [2, 0], sizes = [1, 128], strides = [1, 1]} : vector<4x128xf32> to vector<1x128xf32>
    %20 = vector.broadcast %18 : vector<128x1xf32> to vector<128x128xf32>
    %21 = vector.broadcast %19 : vector<1x128xf32> to vector<128x128xf32>
    %22 = arith.mulf %20, %21 : vector<128x128xf32>
    %23 = arith.addf %17, %22 : vector<128x128xf32>
    %24 = vector.extract_strided_slice %3 {offsets = [0, 3], sizes = [128, 1], strides = [1, 1]} : vector<128x4xf32> to vector<128x1xf32>
    %25 = vector.extract_strided_slice %1 {offsets = [3, 0], sizes = [1, 128], strides = [1, 1]} : vector<4x128xf32> to vector<1x128xf32>
    %26 = vector.broadcast %24 : vector<128x1xf32> to vector<128x128xf32>
    %27 = vector.broadcast %25 : vector<1x128xf32> to vector<128x128xf32>
    %28 = arith.mulf %26, %27 : vector<128x128xf32>
    %29 = arith.addf %23, %28 : vector<128x128xf32>
    %cst = arith.constant 0.000000e+00 : f32
    %30 = vector.broadcast %cst : f32 to vector<128x128xf32>
    %31 = arith.maximumf %29, %30 : vector<128x128xf32>
    %c0_5 = arith.constant 0 : index
    %c0_6 = arith.constant 0 : index
    %32 = vector.load %arg4[%c0_5, %c0_6] : memref<128x128xbf16, #tpu.memory_space<vmem>>, vector<128x128xbf16>
    %33 = arith.truncf %31 : vector<128x128xf32> to vector<128x128xbf16>
    %cst_7 = arith.constant dense<0.000000e+00> : vector<128x128xf32>
    %34 = tpu.matmul %32, %33, %cst_7 {dimension_numbers = #tpu.dot_dimension_numbers<[1], [0], [0], [1], [0, 0, 1, 1], [], []>} : vector<128x128xbf16>, vector<128x128xbf16>, vector<128x128xf32> -> vector<128x128xf32>
    %c0_8 = arith.constant 0 : index
    %c0_9 = arith.constant 0 : index
    %35 = vector.load %arg5[%c0_8, %c0_9] : memref<128x1xf32, #tpu.memory_space<vmem>>, vector<128x1xf32>
    %36 = vector.broadcast %35 : vector<128x1xf32> to vector<128x128xf32>
    %37 = arith.addf %34, %36 : vector<128x128xf32>
    %cst_10 = arith.constant 0.000000e+00 : f32
    %38 = vector.broadcast %cst_10 : f32 to vector<128x128xf32>
    %39 = arith.maximumf %37, %38 : vector<128x128xf32>
    %c0_11 = arith.constant 0 : index
    %c0_12 = arith.constant 0 : index
    %40 = vector.load %arg6[%c0_11, %c0_12] : memref<2x128xbf16, #tpu.memory_space<vmem>>, vector<2x128xbf16>
    %41 = arith.truncf %39 : vector<128x128xf32> to vector<128x128xbf16>
    %cst_13 = arith.constant dense<0.000000e+00> : vector<2x128xf32>
    %42 = tpu.matmul %40, %41, %cst_13 {dimension_numbers = #tpu.dot_dimension_numbers<[1], [0], [0], [1], [0, 0, 1, 1], [], []>} : vector<2x128xbf16>, vector<128x128xbf16>, vector<2x128xf32> -> vector<2x128xf32>
    %c0_14 = arith.constant 0 : index
    %c0_15 = arith.constant 0 : index
    %43 = vector.load %arg7[%c0_14, %c0_15] : memref<2x1xf32, #tpu.memory_space<vmem>>, vector<2x1xf32>
    %44 = vector.broadcast %43 : vector<2x1xf32> to vector<2x128xf32>
    %45 = arith.addf %42, %44 : vector<2x128xf32>
    %c0_16 = arith.constant 0 : index
    %c0_17 = arith.constant 0 : index
    %46 = vector.load %arg8[%c0_16, %c0_17] : memref<2x128xf32, #tpu.memory_space<vmem>>, vector<2x128xf32>
    tpu.vector_store %arg8[%c0_16, %c0_17], %45 {strides = array<i32>} : memref<2x128xf32, #tpu.memory_space<vmem>>, vector<2x128xf32>,
    return
  }
  func.func @transform_0(%arg0: i32) -> (i32, i32) {
    %c0_i32 = arith.constant 0 : i32
    %c0_i32_0 = arith.constant 0 : i32
    return %c0_i32, %arg0 : i32, i32
  }
  func.func @transform_1(%arg0: i32) -> (i32, i32) {
    %c0_i32 = arith.constant 0 : i32
    %c0_i32_0 = arith.constant 0 : i32
    %c0_i32_1 = arith.constant 0 : i32
    return %c0_i32, %c0_i32_0 : i32, i32
  }
  func.func @transform_2(%arg0: i32) -> (i32, i32) {
    %c0_i32 = arith.constant 0 : i32
    %c0_i32_0 = arith.constant 0 : i32
    %c0_i32_1 = arith.constant 0 : i32
    return %c0_i32, %c0_i32_0 : i32, i32
  }
  func.func @transform_3(%arg0: i32) -> (i32, i32) {
    %c0_i32 = arith.constant 0 : i32
    %c0_i32_0 = arith.constant 0 : i32
    %c0_i32_1 = arith.constant 0 : i32
    return %c0_i32, %c0_i32_0 : i32, i32
  }
  func.func @transform_4(%arg0: i32) -> (i32, i32) {
    %c0_i32 = arith.constant 0 : i32
    %c0_i32_0 = arith.constant 0 : i32
    %c0_i32_1 = arith.constant 0 : i32
    return %c0_i32, %c0_i32_0 : i32, i32
  }
  func.func @transform_5(%arg0: i32) -> (i32, i32) {
    %c0_i32 = arith.constant 0 : i32
    %c0_i32_0 = arith.constant 0 : i32
    %c0_i32_1 = arith.constant 0 : i32
    return %c0_i32, %c0_i32_0 : i32, i32
  }
  func.func @transform_6(%arg0: i32) -> (i32, i32) {
    %c0_i32 = arith.constant 0 : i32
    %c0_i32_0 = arith.constant 0 : i32
    %c0_i32_1 = arith.constant 0 : i32
    return %c0_i32, %c0_i32_0 : i32, i32
  }
  func.func @transform_7(%arg0: i32) -> (i32, i32) {
    %c0_i32 = arith.constant 0 : i32
    %c0_i32_0 = arith.constant 0 : i32
    return %c0_i32, %arg0 : i32, i32
  }
}

</mosaic_0001>

<bundles_post_ra>
// kernel: tpu_custom_call.1
= control target key start
LH: loop header
LB: loop body
LE: loop exit
PB: predicated region body
PF: predicated region fallthrough
CT: control target
= control target key end

     0   :  { %12 = vsyncpa [#allocation3], 0  ;;  %s2034_s0 = inlined_call_operand.vmem [shape: bf16[4,256], index: 0, kind: input, shape index: {}]   ;;  %s2035_s1 = inlined_call_operand.vmem [shape: bf16[128,4], index: 1, kind: input, shape index: {}]   ;;  %s2036_s2 = inlined_call_operand.vmem [shape: f32[128,1], index: 2, kind: input, shape index: {}]   ;;  %s2037_s3 = inlined_call_operand.vmem [shape: bf16[128,128], index: 3, kind: input, shape index: {}]   ;;  %s2038_s4 = inlined_call_operand.vmem [shape: f32[128,1], index: 4, kind: input, shape index: {}]   ;;  %s2039_s5 = inlined_call_operand.vmem [shape: bf16[2,128], index: 5, kind: input, shape index: {}]   ;;  %s2040_s6 = inlined_call_operand.vmem [shape: f32[2,1], index: 6, kind: input, shape index: {}]   ;;  %s2041_s7 = inlined_call_operand.hbm [shape: f32[2,256], index: 7, kind: output, shape index: {}]  }
   0x1   :  { %14 = vsyncpa [#allocation3 + $0x1], 0  ;;  %s1602_s24 = smov 0   ;;  %s1604_s25 = smov 0  }
   0x2   :  { %s1606_s26 = smov 0   ;;  %s1608_s27 = smov 0  }
   0x3 LB: > { %s1623_s28 = sadd.s32 4294967295, %s1556_s27   ;;  %s1161_s29 = sadd.s32 4294967294, %s1556_s27   ;;  %s1556_s27 = sphi %s1608_s27, %s2047_s27   ;;  %s1552_s26 = sphi %s1606_s26, %s2046_s26   ;;  %s1548_s25 = sphi %s1604_s25, %s2045_s25   ;;  %s1544_s24 = sphi %s1602_s24, %s2044_s24  }
   0x4   : > { %s1627_s30 = sadd.s32 1, %s1556_s27   ;;  %s179_s8 = sadd.s32 1, %s1552_s26 }
   0x5   : > { %s176_s9 = ssub.s32 %s1556_s27, %s1627_s30  ;;  %p189_p0 = scmp.ne.s32.totalorder %s1552_s26, %s1548_s25 }
   0x6   : > { %p177_p1 = scmp.eq.s32.totalorder %s176_s9, 0  ;;  %p190_p2 = scmp.eq.s32.totalorder %s1623_s28, 1 }
   0x7   : > { %p195_p3 = scmp.ne.s32.totalorder %s1548_s25, %s1544_s24  ;;  %p196_p4 = scmp.eq.s32.totalorder %s1161_s29, 1 }
   0x8   : > { %s1638_s10 = scalar_select %p177_p1, %s1552_s26, %s179_s8  }
   0x9   : > { %p1640_p5 = por %p190_p2, %p189_p0  ;;  %p1644_p6 = por %p196_p4, %p195_p3 }
   0xa   : > { %p1164_p7 = scmp.ge.s32.totalorder %s1556_s27, 1  ;;  %p239_p8 = scmp.lt.s32.totalorder %s1556_s27, 3 }
   0xc   : > { %p240_p9 = pnand %p1164_p7, %p239_p8 }
   0xd   : > { %p270_p10 = scmp.lt.s32.totalorder (!%p240_p9), %s1623_s28, 1  ;;  %s1200_s21 = sshll.u32 (!%p240_p9), %s1623_s28, 1 }
   0xe   : > { %243 = sbr.rel (%p240_p9) target bundleno = 640 (0x280), region = 48  ;;  %s1097_s8 = scalar_lea.hbm (!%p240_p9), %s2041_s7, %s1200_s21 }
   0xf   : > { %s1101_s14 = sshll.u32 (!%p240_p9), %s1097_s8, 4  ;;  %s1102_s14 = int_to_ptr.hbm [resolvable:$true] %s1101_s14 }
  0x10   : > { %s1508_s16 = sshra.s32 (!%p240_p9), %s1102_s14, 4  ;;  %s1509_s16 = int_to_ptr.hbm [resolvable:$true] %s1508_s16 }
  0x11   : > { %s1510_s17 = scalar_lea.hbm (!%p240_p9), %s1509_s16, 2  ;;  %p1515_p0 = scmp.lt.s32.totalorder (!%p240_p9), %s1509_s16, %s2041_s7 }
  0x12   : > { %p1511_p11 = scmp.ne.s32.totalorder (!%p240_p9), %s1509_s16, %s1510_s17 }
  0x13   : > { %v1246_v0 = vld [vmem:[%s2035_s1 + $0x20] sm:$0xff]   ;;  %v1244_v1 = vld [vmem:[%s2035_s1 + $0x10] sm:$0xff]   ;;  %v1558_v3 = vmov 0   ;;  %v1247_v10 = vld [vmem:[%s2035_s1 + $0x28] sm:$0xff]   ;;  %v1559_v47 = vmov 2   ;;  %v1560_v48 = vmov 1  }
  0x14   : > { %v1212_v2 = vld [vmem:[%s2035_s1] sm:$0xff]   ;;  %1331 = vset.pattern.permute.xlu2 %v1558_v3  ;;  %1320 = vset.pattern.permute.xlu1 %v1558_v3  ;;  %v1229_v4 = vunpack.c.l.bf16 %v1246_v0  ;;  %v1230_v5 = vunpack.c.h.bf16 %v1246_v0  ;;  %v1221_v6 = vunpack.c.l.bf16 %v1244_v1  ;;  %v1222_v7 = vunpack.c.h.bf16 %v1244_v1  ;;  %v1245_v11 = vld [vmem:[%s2035_s1 + $0x18] sm:$0xff]   ;;  %v1243_v14 = vld [vmem:[%s2035_s1 + $0x8] sm:$0xff]   ;;  %s271_s19 = scalar_select %p270_p10, %s1623_s28, 1 }
  0x15   : > { %1309 = vset.pattern.permute.xlu0 %v1558_v3  ;;  %v1213_v8 = vunpack.c.l.bf16 %v1212_v2  ;;  %v1214_v9 = vunpack.c.h.bf16 %v1212_v2  ;;  %v1233_v16 = vunpack.c.l.bf16 %v1247_v10  ;;  %v1234_v17 = vunpack.c.h.bf16 %v1247_v10  ;;  %v1249_v25 = vld [vmem:[%s2035_s1 + $0x38] sm:$0xff]   ;;  %v1248_v26 = vld [vmem:[%s2035_s1 + $0x30] sm:$0xff]   ;;  %v308_v32 = vld [vmem:[%s2036_s2] sm:$0xff]  ;;  %p1512_p12 = pnand %p1511_p11, %p1640_p5 }
  0x16   : > { %v1668_v12 = vpack.i.bf16 %v1230_v5, %v1229_v4  ;;  %v1670_v13 = vpack.i.bf16 %v1222_v7, %v1221_v6  ;;  %v1225_v18 = vunpack.c.l.bf16 %v1245_v11  ;;  %v1226_v19 = vunpack.c.h.bf16 %v1245_v11  ;;  %v311_v34 = vld [vmem:[%s2036_s2 + $0x18] sm:$0xff]  ;;  %v310_v35 = vld [vmem:[%s2036_s2 + $0x10] sm:$0xff]  ;;  %v309_v36 = vld [vmem:[%s2036_s2 + $0x8] sm:$0xff]  ;;  %s1166_s20 = sshll.u32 %s271_s19, 1  ;;  %s1514_s19 = scalar_lea.hbm %s2041_s7, 4 }
  0x17   : > { %v1675_v15 = vpack.i.bf16 %v1214_v9, %v1213_v8  ;;  %v1217_v20 = vunpack.c.l.bf16 %v1243_v14  ;;  %v1218_v21 = vunpack.c.h.bf16 %v1243_v14  ;;  %v1680_v22 = vpack.i.bf16 %v1234_v17, %v1233_v16  ;;  %v314_v37 = vld [vmem:[%s2036_s2 + $0x30] sm:$0xff]  ;;  %v313_v38 = vld [vmem:[%s2036_s2 + $0x28] sm:$0xff]  ;;  %v312_v39 = vld [vmem:[%s2036_s2 + $0x20] sm:$0xff]  ;;  %s273_s23 = scalar_lea.vmem %s2034_s0, %s1166_s20  ;;  %s267_s20 = sand.u32 1, %s1548_s25  }
  0x18   : > { %1333 = vperm.xlu2 %1331, %v1668_v12   ;;  %1322 = vperm.xlu1 %1320, %v1670_v13   ;;  %v1682_v23 = vpack.i.bf16 %v1226_v19, %v1225_v18  ;;  %v1241_v27 = vunpack.c.l.bf16 %v1249_v25  ;;  %v1242_v28 = vunpack.c.h.bf16 %v1249_v25  ;;  %v1237_v29 = vunpack.c.l.bf16 %v1248_v26  ;;  %v317_v40 = vld [vmem:[%s2036_s2 + $0x48] sm:$0xff]  ;;  %v316_v41 = vld [vmem:[%s2036_s2 + $0x40] sm:$0xff]  ;;  %v315_v42 = vld [vmem:[%s2036_s2 + $0x38] sm:$0xff]  ;;  %s1165_s22 = sshll.u32 %s267_s20, 1  ;;  %s1087_s15 = scalar_lea.sflag [#allocation3], %s267_s20 }
  0x19   : > { %1311 = vperm.xlu0 %1309, %v1675_v15   ;;  %v1684_v24 = vpack.i.bf16 %v1218_v21, %v1217_v20  ;;  %v1238_v30 = vunpack.c.h.bf16 %v1248_v26  ;;  %v323_v43 = vld [vmem:[%s2036_s2 + $0x78] sm:$0xff]  ;;  %v322_v44 = vld [vmem:[%s2036_s2 + $0x70] sm:$0xff]  ;;  %v320_v46 = vld [vmem:[%s2036_s2 + $0x60] sm:$0xff]  ;;  %v1561_v51 = vmov 3   ;;  %s269_s9 = scalar_lea.vmem [#allocation2], %s1165_s22  ;;  %p1513_p13 = pneg %p1512_p12 }
  0x1a   : > { %v1347_v31 = vpack.i.bf16 %v1242_v28, %v1241_v27  ;;  %v318_v45 = vld [vmem:[%s2036_s2 + $0x50] sm:$0xff]  ;;  %v321_v49 = vld [vmem:[%s2036_s2 + $0x68] sm:$0xff]  ;;  %v319_v50 = vld [vmem:[%s2036_s2 + $0x58] sm:$0xff]  ;;  %s1099_s13 = sshll.u32 %s269_s9, 4  ;;  %p1516_p1 = scmp.lt.s32.totalorder %s1514_s19, %s1510_s17  ;;  %s1100_s13 = int_to_ptr.vmem [resolvable:$true] %s1099_s13 }
  0x1b   : > { %v1342_v33 = vpack.i.bf16 %v1238_v30, %v1237_v29  ;;  %v274_v55 = vld [vmem:[%s273_s23] sm:$0x3] }
  0x1c   : > { %v1772_v56 = vunpack.c.l.bf16 %v274_v55  ;;  %p1517_p2 = por %p1516_p1, %p1515_p0 }
  0x1e   : > { %v1776_v62 = vperm.slane %v1772_v56, 0  ;;  %p1518_p3 = pnand %p1517_p2, %p1513_p13 }
  0x20   : > { %1338 = vperm.xlu2 %1331, %v1680_v22   ;;  %1327 = vperm.xlu1 %1320, %v1682_v23  }
  0x21   : > { %1316 = vperm.xlu0 %1309, %v1684_v24  }
  0x28   : > { %423 = vperm.xlu2 %1331, %v308_v32   ;;  %1348 = vperm.xlu1 %1320, %v1347_v31  }
  0x29   : > { %1343 = vperm.xlu0 %1309, %v1342_v33  }
  0x30   : > { %438 = vperm.xlu2 %1331, %v311_v34   ;;  %433 = vperm.xlu1 %1320, %v310_v35  }
  0x31   : > { %428 = vperm.xlu0 %1309, %v309_v36  }
  0x38   : > { %453 = vperm.xlu2 %1331, %v314_v37   ;;  %448 = vperm.xlu1 %1320, %v313_v38  }
  0x39   : > { %443 = vperm.xlu0 %1309, %v312_v39  }
  0x40   : > { %468 = vperm.xlu2 %1331, %v317_v40   ;;  %463 = vperm.xlu1 %1320, %v316_v41  }
  0x41   : > { %458 = vperm.xlu0 %1309, %v315_v42  }
  0x48   : > { %498 = vperm.xlu2 %1331, %v323_v43   ;;  %493 = vperm.xlu1 %1320, %v322_v44  }
  0x49   : > { %473 = vperm.xlu0 %1309, %v318_v45  }
  0x50   : > { %483 = vperm.xlu2 %1331, %v320_v46   ;;  %1358 = vset.pattern.permute.xlu1 %v1559_v47 }
  0x51   : > { %1352 = vset.pattern.permute.xlu0 %v1560_v48  ;;  %1360 = vperm.xlu1 %1358, %v1347_v31  }
  0x52   : > { %1354 = vperm.xlu0 %1352, %v1347_v31  }
  0x58   : > { %1365 = vset.pattern.permute.xlu2 %v1560_v48 }
  0x59   : > { %1367 = vperm.xlu2 %1365, %v1342_v33   ;;  %1364 = vset.pattern.permute.xlu1 %v1558_v3 }
  0x5a   : > { %1390 = vset.pattern.permute.xlu0 %v1559_v47  ;;  %488 = vperm.xlu1 %1364, %v321_v49  }
  0x5b   : > { %1392 = vperm.xlu0 %1390, %v1680_v22  }
  0x61   : > { %1377 = vset.pattern.permute.xlu2 %v1558_v3 }
  0x62   : > { %478 = vperm.xlu2 %1377, %v319_v50   ;;  %1371 = vset.pattern.permute.xlu1 %v1559_v47 }
  0x63   : > { %1396 = vset.pattern.permute.xlu0 %v1561_v51  ;;  %1373 = vperm.xlu1 %1371, %v1342_v33  }
  0x64   : > { %1398 = vperm.xlu0 %1396, %v1347_v31  }
  0x6a   : > { %1384 = vset.pattern.permute.xlu2 %v1561_v51 }
  0x6b   : > { %1386 = vperm.xlu2 %1384, %v1342_v33   ;;  %1378 = vset.pattern.permute.xlu1 %v1560_v48 }
  0x6c   : > { %1425 = vperm.xlu0 %1396, %v1668_v12   ;;  %1380 = vperm.xlu1 %1378, %v1680_v22  }
  0x72   : > { %v1753_v52 = vpop.permute.xlu2 %1333 }
  0x73   : > { %1408 = vperm.xlu2 %1384, %v1680_v22  }
  0x74   : > { %1451 = vset.pattern.permute.xlu0 %v1560_v48  ;;  %1403 = vperm.xlu1 %1378, %v1668_v12  }
  0x75   : > { %1453 = vperm.xlu0 %1451, %v1684_v24  }
  0x7a   : > { %v1760_v53 = vpop.permute.xlu2 %1338 }
  0x7b   : > { %1418 = vset.pattern.permute.xlu2 %v1560_v48 }
  0x7c   : > { %1420 = vperm.xlu2 %1418, %v1682_v23   ;;  %1412 = vset.pattern.permute.xlu1 %v1559_v47 }
  0x7d   : > { %1414 = vperm.xlu1 %1412, %v1668_v12   ;;  %1479 = vset.pattern.permute.xlu0 %v1559_v47 }
  0x7e   : > { %1481 = vperm.xlu0 %1479, %v1675_v15  }
  0x82   : > { %v424_v54 = vpop.permute.xlu2 %423 }
  0x84   : > { %1435 = vperm.xlu2 %1418, %v1670_v13  }
  0x85   : > { %1430 = vperm.xlu1 %1412, %v1682_v23  }
  0x86   : > { %1493 = vset.pattern.permute.xlu0 %v1558_v3 }
  0x8a   : > { %v439_v57 = vpop.permute.xlu2 %438  ;;  %v1323_v58 = vpop.permute.xlu1 %1322 }
  0x8b   : > { %v1312_v59 = vpop.permute.xlu0 %1311  ;;  %v1324_v25 = vunpack.i.l.bf16 %v1323_v58 }
  0x8c   : > { %v1314_v60 = vunpack.i.h.bf16 %v1312_v59  ;;  %v1313_v61 = vunpack.i.l.bf16 %v1312_v59  ;;  %1445 = vset.pattern.permute.xlu2 %v1559_v47 }
  0x8d   : > { %1447 = vperm.xlu2 %1445, %v1670_v13   ;;  %1439 = vset.pattern.permute.xlu1 %v1561_v51  ;;  %v409_v28 = vmul.f32 %v1324_v25, %v1776_v62 }
  0x8e   : > { %v405_v63 = vmul.f32 %v1313_v61, %v1776_v62  ;;  %1441 = vperm.xlu1 %1439, %v1682_v23   ;;  %v406_v0 = vmul.f32 %v1314_v60, %v1776_v62  ;;  %v1325_v23 = vunpack.i.h.bf16 %v1323_v58 }
  0x90   : > { %v1783_v1 = vadd.f32 %v424_v54, %v405_v63  ;;  %v1828_v54 = vperm.slane %v1772_v56, 1 }
  0x92   : > { %v454_v2 = vpop.permute.xlu2 %453  ;;  %v1328_v4 = vpop.permute.xlu1 %1327 }
  0x93   : > { %v1329_v5 = vunpack.i.l.bf16 %v1328_v4  ;;  %v1317_v6 = vpop.permute.xlu0 %1316  ;;  %v1330_v32 = vunpack.i.h.bf16 %v1328_v4 }
  0x94   : > { %v1319_v7 = vunpack.i.h.bf16 %v1317_v6  ;;  %v1318_v16 = vunpack.i.l.bf16 %v1317_v6 }
  0x95   : > { %v411_v8 = vmul.f32 %v1329_v5, %v1776_v62  ;;  %1463 = vperm.xlu2 %1445, %v1684_v24   ;;  %v412_v34 = vmul.f32 %v1330_v32, %v1776_v62 }
  0x96   : > { %v408_v9 = vmul.f32 %v1319_v7, %v1776_v62  ;;  %1458 = vperm.xlu1 %1439, %v1670_v13   ;;  %v407_v18 = vmul.f32 %v1318_v16, %v1776_v62 }
  0x97   : > { %v1789_v10 = vadd.f32 %v454_v2, %v411_v8  ;;  %v1837_v2 = vperm.slane %v1772_v56, 2 }
  0x98   : > { %v1791_v11 = vadd.f32 %v439_v57, %v408_v9 }
  0x9a   : > { %v1793_v12 = vpop.permute.xlu2 %468  ;;  %v1349_v14 = vpop.permute.xlu1 %1348 }
  0x9b   : > { %v1344_v17 = vpop.permute.xlu0 %1343  ;;  %v1351_v45 = vunpack.i.h.bf16 %v1349_v14 }
  0x9c   : > { %v1345_v43 = vunpack.i.l.bf16 %v1344_v17  ;;  %v1346_v50 = vunpack.i.h.bf16 %v1344_v17 }
  0x9d   : > { %1473 = vset.pattern.permute.xlu2 %v1561_v51  ;;  %v420_v58 = vmul.f32 %v1351_v45, %v1776_v62 }
  0x9e   : > { %1467 = vset.pattern.permute.xlu1 %v1560_v48  ;;  %1475 = vperm.xlu2 %1473, %v1684_v24   ;;  %v410_v24 = vmul.f32 %v1325_v23, %v1776_v62  ;;  %v417_v55 = vmul.f32 %v1345_v43, %v1776_v62  ;;  %v418_v4 = vmul.f32 %v1346_v50, %v1776_v62  ;;  %v1843_v23 = vperm.slane %v1772_v56, 3 }
  0x9f   : > { %1469 = vperm.xlu1 %1467, %v1675_v15  }
  0xa2   : > { %v499_v13 = vpop.permute.xlu2 %498  ;;  %v434_v19 = vpop.permute.xlu1 %433 }
  0xa3   : > { %v1800_v20 = vadd.f32 %v434_v19, %v407_v18  ;;  %v429_v21 = vpop.permute.xlu0 %428  ;;  %v516_v5 = vadd.f32 %v499_v13, %v420_v58  ;;  %v1340_v18 = vunpack.i.l.bf16 %v1760_v53 }
  0xa4   : > { %v1802_v22 = vadd.f32 %v429_v21, %v406_v0 }
  0xa6   : > { %1491 = vset.pattern.permute.xlu2 %v1558_v3 }
  0xa7   : > { %1485 = vset.pattern.permute.xlu1 %v1561_v51 }
  0xa8   : > { %1487 = vperm.xlu1 %1485, %v1675_v15  }
  0xaa   : > { %v484_v26 = vpop.permute.xlu2 %483  ;;  %v449_v27 = vpop.permute.xlu1 %448 }
  0xab   : > { %v1809_v29 = vadd.f32 %v449_v27, %v410_v24  ;;  %v444_v30 = vpop.permute.xlu0 %443  ;;  %v513_v9 = vadd.f32 %v484_v26, %v417_v55  ;;  %v415_v55 = vmul.f32 %v1340_v18, %v1776_v62 }
  0xac   : > { %v1811_v31 = vadd.f32 %v444_v30, %v409_v28 }
  0xb0   : > { %1492 = vset.pattern.permute.xlu1 %v1558_v3  ;;  %v1350_v3 = vunpack.i.l.bf16 %v1349_v14 }
  0xb2   : > { %v1814_v33 = vpop.permute.xlu1 %463  ;;  %v419_v59 = vmul.f32 %v1350_v3, %v1776_v62  ;;  %v1341_v3 = vunpack.i.h.bf16 %v1760_v53 }
  0xb3   : > { %v459_v35 = vpop.permute.xlu0 %458  ;;  %v1368_v15 = vpop.permute.xlu2 %1367 }
  0xb4   : > { %v1817_v36 = vadd.f32 %v459_v35, %v412_v34  ;;  %v1369_v51 = vunpack.i.l.bf16 %v1368_v15  ;;  %v1370_v57 = vunpack.i.h.bf16 %v1368_v15 }
  0xb6   : > { %v594_v63 = vmul.f32 %v1369_v51, %v1828_v54  ;;  %v595_v14 = vmul.f32 %v1370_v57, %v1828_v54 }
  0xb8   : > { %v610_v24 = vadd.f32 %v594_v63, %v513_v9 }
  0xba   : > { %v494_v37 = vpop.permute.xlu1 %493 }
  0xbb   : > { %v1819_v38 = vpop.permute.xlu0 %473  ;;  %v515_v6 = vadd.f32 %v494_v37, %v419_v59 }
  0xbc   : > { %v1821_v39 = vpop.permute.xlu2 %478 }
  0xc3   : > { %v1361_v40 = vpop.permute.xlu1 %1360 }
  0xc4   : > { %v1355_v41 = vpop.permute.xlu0 %1354  ;;  %v1362_v0 = vunpack.i.l.bf16 %v1361_v40  ;;  %v1363_v7 = vunpack.i.h.bf16 %v1361_v40 }
  0xc5   : > { %v1387_v42 = vpop.permute.xlu2 %1386  ;;  %v1357_v46 = vunpack.i.h.bf16 %v1355_v41  ;;  %v1356_v47 = vunpack.i.l.bf16 %v1355_v41 }
  0xc6   : > { %v1388_v8 = vunpack.i.l.bf16 %v1387_v42  ;;  %v1389_v16 = vunpack.i.h.bf16 %v1387_v42  ;;  %v693_v27 = vmul.f32 %v1362_v0, %v1837_v2  ;;  %v694_v26 = vmul.f32 %v1363_v7, %v1837_v2 }
  0xc7   : > { %v596_v60 = vmul.f32 %v1356_v47, %v1828_v54  ;;  %v597_v61 = vmul.f32 %v1357_v46, %v1828_v54  ;;  %v511_v0 = vadd.f32 %v1819_v38, %v415_v55 }
  0xc8   : > { %v788_v34 = vmul.f32 %v1388_v8, %v1843_v23  ;;  %v789_v37 = vmul.f32 %v1389_v16, %v1843_v23 }
  0xc9   : > { %v612_v19 = vadd.f32 %v596_v60, %v515_v6  ;;  %v613_v21 = vadd.f32 %v597_v61, %v516_v5 }
  0xcb   : > { %v709_v42 = vadd.f32 %v693_v27, %v612_v19  ;;  %v710_v43 = vadd.f32 %v694_v26, %v613_v21 }
  0xcc   : > { %v489_v44 = vpop.permute.xlu1 %488 }
  0xcd   : > { %v1823_v48 = vpop.permute.xlu0 %1392  ;;  %v1825_v49 = vpop.permute.xlu2 %1408  ;;  %v514_v17 = vadd.f32 %v489_v44, %v418_v4  ;;  %v416_v4 = vmul.f32 %v1341_v3, %v1776_v62 }
  0xce   : > { %v1395_v59 = vunpack.i.h.bf16 %v1823_v48  ;;  %v1394_v60 = vunpack.i.l.bf16 %v1823_v48  ;;  %v1411_v6 = vunpack.i.h.bf16 %v1825_v49  ;;  %v1410_v7 = vunpack.i.l.bf16 %v1825_v49 }
  0xcf   : > { %v611_v40 = vadd.f32 %v595_v14, %v514_v17  ;;  %v512_v14 = vadd.f32 %v1821_v39, %v416_v4 }
  0xd0   : > { %v689_v18 = vmul.f32 %v1394_v60, %v1837_v2  ;;  %v690_v38 = vmul.f32 %v1395_v59, %v1837_v2  ;;  %v787_v49 = vmul.f32 %v1411_v6, %v1843_v23 }
  0xd5   : > { %v1374_v25 = vpop.permute.xlu1 %1373 }
  0xd6   : > { %v1376_v13 = vunpack.i.h.bf16 %v1374_v25  ;;  %v1375_v28 = vunpack.i.l.bf16 %v1374_v25  ;;  %v1399_v30 = vpop.permute.xlu0 %1398  ;;  %v1846_v32 = vpop.permute.xlu2 %1420  ;;  %v786_v25 = vmul.f32 %v1410_v7, %v1843_v23 }
  0xd7   : > { %v1401_v35 = vunpack.i.h.bf16 %v1399_v30  ;;  %v1400_v15 = vunpack.i.l.bf16 %v1399_v30 }
  0xd8   : > { %v691_v56 = vmul.f32 %v1375_v28, %v1837_v2  ;;  %v692_v41 = vmul.f32 %v1376_v13, %v1837_v2 }
  0xd9   : > { %v790_v44 = vmul.f32 %v1400_v15, %v1843_v23  ;;  %v791_v45 = vmul.f32 %v1401_v35, %v1843_v23 }
  0xda   : > { %v707_v46 = vadd.f32 %v691_v56, %v610_v24  ;;  %v708_v47 = vadd.f32 %v692_v41, %v611_v40  ;;  %v1335_v40 = vunpack.i.l.bf16 %v1753_v52 }
  0xdb   : > { %v806_v50 = vadd.f32 %v790_v44, %v709_v42  ;;  %v807_v51 = vadd.f32 %v791_v45, %v710_v43 }
  0xdc   : > { %v804_v57 = vadd.f32 %v788_v34, %v707_v46  ;;  %v805_v58 = vadd.f32 %v789_v37, %v708_v47  ;;  %v1336_v37 = vunpack.i.h.bf16 %v1753_v52  ;;  %v413_v3 = vmul.f32 %v1335_v40, %v1776_v62 }
  0xdd   : > { %v822_v61 = vmax.f32 %v806_v50, 0.0  ;;  %v823_v63 = vmax.f32 %v807_v51, 0.0 }
  0xde   : > { %v1861_v5 = vpop.permute.xlu2 %1435  ;;  %v1381_v53 = vpop.permute.xlu1 %1380  ;;  %v820_v17 = vmax.f32 %v804_v57, 0.0  ;;  %v821_v48 = vmax.f32 %v805_v58, 0.0  ;;  %v414_v45 = vmul.f32 %v1336_v37, %v1776_v62  ;;  %v509_v57 = vadd.f32 %v1814_v33, %v413_v3 }
  0xdf   : > { %v1383_v8 = vunpack.i.h.bf16 %v1381_v53  ;;  %v1382_v9 = vunpack.i.l.bf16 %v1381_v53  ;;  %v847_v16 = vpack.c.bf16 %v823_v63, %v822_v61  ;;  %v1426_v39 = vpop.permute.xlu0 %1425 }
  0xe0   : > { %v846_v13 = vpack.c.bf16 %v821_v48, %v820_v17  ;;  %v1428_v46 = vunpack.i.h.bf16 %v1426_v39  ;;  %v1427_v47 = vunpack.i.l.bf16 %v1426_v39  ;;  %v510_v52 = vadd.f32 %v1793_v12, %v414_v45 }
  0xe1   : > { %v592_v19 = vmul.f32 %v1382_v9, %v1828_v54  ;;  %v593_v21 = vmul.f32 %v1383_v8, %v1828_v54  ;;  %992 = vmatpush.bf16.msra.mxu0 %v847_v16  ;;  %1250 = vmatpush.bf16.msra.mxu2 %v847_v16 }
  0xe2   : > { %1251 = vmatpush.bf16.msra.mxu3 %v847_v16  ;;  %v785_v4 = vmul.f32 %v1428_v46, %v1843_v23 }
  0xe3   : > { %v608_v24 = vadd.f32 %v592_v19, %v511_v0  ;;  %v609_v27 = vadd.f32 %v593_v21, %v512_v14  ;;  %v784_v0 = vmul.f32 %v1427_v47, %v1843_v23  ;;  %v1423_v21 = vunpack.i.h.bf16 %v1846_v32 }
  0xe5   : > { %v705_v28 = vadd.f32 %v689_v18, %v608_v24  ;;  %v706_v30 = vadd.f32 %v690_v38, %v609_v27  ;;  %993 = vmatpush.bf16.msra.mxu0 %v846_v13  ;;  %1252 = vmatpush.bf16.msra.mxu2 %v846_v13 }
  0xe6   : > { %v1404_v26 = vpop.permute.xlu1 %1403  ;;  %1253 = vmatpush.bf16.msra.mxu3 %v846_v13 }
  0xe7   : > { %v1872_v34 = vpop.permute.xlu2 %1447  ;;  %v802_v35 = vadd.f32 %v786_v25, %v705_v28  ;;  %v803_v15 = vadd.f32 %v787_v49, %v706_v30  ;;  %v1406_v56 = vunpack.i.h.bf16 %v1404_v26  ;;  %v1405_v41 = vunpack.i.l.bf16 %v1404_v26  ;;  %v1454_v55 = vpop.permute.xlu0 %1453 }
  0xe8   : > { %v1456_v60 = vunpack.i.h.bf16 %v1454_v55  ;;  %v1455_v61 = vunpack.i.l.bf16 %v1454_v55  ;;  %v1422_v25 = vunpack.i.l.bf16 %v1846_v32 }
  0xe9   : > { %v818_v42 = vmax.f32 %v802_v35, 0.0  ;;  %v819_v43 = vmax.f32 %v803_v15, 0.0  ;;  %v590_v50 = vmul.f32 %v1405_v41, %v1828_v54  ;;  %v591_v51 = vmul.f32 %v1406_v56, %v1828_v54 }
  0xea   : > { %v584_v33 = vmul.f32 %v1455_v61, %v1828_v54  ;;  %v585_v14 = vmul.f32 %v1456_v60, %v1828_v54  ;;  %v588_v32 = vmul.f32 %v1422_v25, %v1828_v54  ;;  %v1450_v60 = vunpack.i.h.bf16 %v1872_v34 }
  0xeb   : > { %v845_v44 = vpack.c.bf16 %v819_v43, %v818_v42  ;;  %v606_v53 = vadd.f32 %v590_v50, %v509_v57  ;;  %v607_v6 = vadd.f32 %v591_v51, %v510_v52  ;;  %v1437_v51 = vunpack.i.l.bf16 %v1861_v5 }
  0xec   : > { %v600_v24 = vadd.f32 %v584_v33, %v1800_v20  ;;  %v601_v27 = vadd.f32 %v585_v14, %v1791_v11  ;;  %v589_v20 = vmul.f32 %v1423_v21, %v1828_v54  ;;  %v604_v47 = vadd.f32 %v588_v32, %v1789_v10 }
  0xed   : > { %994 = vmatpush.bf16.msra.mxu0 %v845_v44  ;;  %1254 = vmatpush.bf16.msra.mxu2 %v845_v44  ;;  %v1438_v52 = vunpack.i.h.bf16 %v1861_v5  ;;  %v1449_v61 = vunpack.i.l.bf16 %v1872_v34 }
  0xee   : > { %1255 = vmatpush.bf16.msra.mxu3 %v845_v44  ;;  %v605_v50 = vadd.f32 %v589_v20, %v1817_v36  ;;  %v586_v36 = vmul.f32 %v1437_v51, %v1828_v54  ;;  %v855_v51 = vld [vmem:[%s2038_s4 + $0x38] sm:$0xff] }
  0xef   : > { %v1415_v58 = vpop.permute.xlu1 %1414  ;;  %v1464_v59 = vpop.permute.xlu2 %1463  ;;  %v683_v5 = vmul.f32 %v1449_v61, %v1837_v2  ;;  %v859_v61 = vld [vmem:[%s2038_s4 + $0x58] sm:$0xff] }
  0xf0   : > { %v1417_v63 = vunpack.i.h.bf16 %v1415_v58  ;;  %v1416_v62 = vunpack.i.l.bf16 %v1415_v58  ;;  %v1466_v9 = vunpack.i.h.bf16 %v1464_v59  ;;  %v1465_v12 = vunpack.i.l.bf16 %v1464_v59 }
  0xf1   : > { %v602_v34 = vadd.f32 %v586_v36, %v1811_v31  ;;  %v1206_v36 = vld [vmem:[%s2037_s3 + $0x18] sm:$0xff] }
  0xf2   : > { %v687_v7 = vmul.f32 %v1416_v62, %v1837_v2  ;;  %v688_v8 = vmul.f32 %v1417_v63, %v1837_v2  ;;  %v681_v48 = vmul.f32 %v1465_v12, %v1837_v2  ;;  %v682_v18 = vmul.f32 %v1466_v9, %v1837_v2 }
  0xf4   : > { %v703_v16 = vadd.f32 %v687_v7, %v606_v53  ;;  %v704_v17 = vadd.f32 %v688_v8, %v607_v6  ;;  %v697_v35 = vadd.f32 %v681_v48, %v600_v24  ;;  %v698_v15 = vadd.f32 %v682_v18, %v601_v27  ;;  %v863_v48 = vld [vmem:[%s2038_s4 + $0x78] sm:$0xff] }
  0xf5   : > { %v684_v7 = vmul.f32 %v1450_v60, %v1837_v2  ;;  %v699_v18 = vadd.f32 %v683_v5, %v602_v34  ;;  %941 = vperm.xlu1 %1492, %v863_v48   ;;  %v1208_v60 = vld [vmem:[%s2037_s3 + $0x28] sm:$0xff]  ;;  %v851_v5 = vld [vmem:[%s2038_s4 + $0x18] sm:$0xff] }
  0xf6   : > { %v800_v38 = vadd.f32 %v784_v0, %v703_v16  ;;  %v801_v19 = vadd.f32 %v785_v4, %v704_v17  ;;  %v587_v4 = vmul.f32 %v1438_v52, %v1828_v54 }
  0xf7   : > { %v1431_v49 = vpop.permute.xlu1 %1430 }
  0xf8   : > { %v1476_v39 = vpop.permute.xlu2 %1475  ;;  %v816_v13 = vmax.f32 %v800_v38, 0.0  ;;  %v817_v28 = vmax.f32 %v801_v19, 0.0  ;;  %v1433_v40 = vunpack.i.h.bf16 %v1431_v49  ;;  %v1432_v56 = vunpack.i.l.bf16 %v1431_v49  ;;  %v861_v38 = vld [vmem:[%s2038_s4 + $0x68] sm:$0xff]  ;;  %v1482_v49 = vpop.permute.xlu0 %1481 }
  0xf9   : > { %v1478_v30 = vunpack.i.h.bf16 %v1476_v39  ;;  %v1477_v26 = vunpack.i.l.bf16 %v1476_v39  ;;  %v603_v33 = vadd.f32 %v587_v4, %v1809_v29  ;;  %931 = vperm.xlu0 %1493, %v861_v38   ;;  %v858_v39 = vld [vmem:[%s2038_s4 + $0x50] sm:$0xff]  ;;  %v1204_v4 = vld [vmem:[%s2037_s3 + $0x8] sm:$0xff] }
  0xfa   : > { %v844_v37 = vpack.c.bf16 %v817_v28, %v816_v13  ;;  %v685_v44 = vmul.f32 %v1432_v56, %v1837_v2  ;;  %v686_v45 = vmul.f32 %v1433_v40, %v1837_v2  ;;  %v1484_v13 = vunpack.i.h.bf16 %v1482_v49 }
  0xfb   : > { %v778_v41 = vmul.f32 %v1477_v26, %v1843_v23  ;;  %v779_v42 = vmul.f32 %v1478_v30, %v1843_v23  ;;  %v700_v19 = vadd.f32 %v684_v7, %v603_v33  ;;  %v1483_v28 = vunpack.i.l.bf16 %v1482_v49  ;;  %v1207_v7 = vld [vmem:[%s2037_s3 + $0x20] sm:$0xff] }
  0xfc   : > { %995 = vmatpush.bf16.msra.mxu0 %v844_v37  ;;  %1256 = vmatpush.bf16.msra.mxu2 %v844_v37  ;;  %v701_v63 = vadd.f32 %v685_v44, %v604_v47  ;;  %v702_v62 = vadd.f32 %v686_v45, %v605_v50  ;;  %v860_v50 = vld [vmem:[%s2038_s4 + $0x60] sm:$0xff] }
  0xfd   : > { %v794_v11 = vadd.f32 %v778_v41, %v697_v35  ;;  %v795_v43 = vadd.f32 %v779_v42, %v698_v15  ;;  %1257 = vmatpush.bf16.msra.mxu3 %v844_v37  ;;  %916 = vperm.xlu1 %1492, %v858_v39   ;;  %v679_v56 = vmul.f32 %v1483_v28, %v1837_v2 }
  0xfe   : > { %v680_v41 = vmul.f32 %v1484_v13, %v1837_v2  ;;  %v854_v2 = vld [vmem:[%s2038_s4 + $0x30] sm:$0xff] }
  0xff   : > { %v810_v3 = vmax.f32 %v794_v11, 0.0  ;;  %v811_v46 = vmax.f32 %v795_v43, 0.0  ;;  %v862_v43 = vld [vmem:[%s2038_s4 + $0x70] sm:$0xff] }
 0x100   : > { %v1442_v55 = vpop.permute.xlu1 %1441  ;;  %936 = vperm.xlu2 %1491, %v862_v43  }
 0x101   : > { %v1444_v57 = vunpack.i.h.bf16 %v1442_v55  ;;  %v1443_v58 = vunpack.i.l.bf16 %v1442_v55  ;;  %v841_v59 = vpack.c.bf16 %v811_v46, %v810_v3  ;;  %896 = vperm.xlu0 %1493, %v854_v2   ;;  %v853_v55 = vld [vmem:[%s2038_s4 + $0x28] sm:$0xff] }
 0x103   : > { %v782_v0 = vmul.f32 %v1443_v58, %v1843_v23  ;;  %v783_v10 = vmul.f32 %v1444_v57, %v1843_v23 }
 0x105   : > { %v798_v53 = vadd.f32 %v782_v0, %v701_v63  ;;  %v799_v6 = vadd.f32 %v783_v10, %v702_v62  ;;  %v850_v63 = vld [vmem:[%s2038_s4 + $0x10] sm:$0xff]  ;;  %v848_v62 = vld [vmem:[%s2038_s4] sm:$0xff]  ;;  %v857_v0 = vld [vmem:[%s2038_s4 + $0x48] sm:$0xff] }
 0x106   : > { %v849_v10 = vld [vmem:[%s2038_s4 + $0x8] sm:$0xff] }
 0x107   : > { %v814_v8 = vmax.f32 %v798_v53, 0.0  ;;  %v815_v9 = vmax.f32 %v799_v6, 0.0  ;;  %v1209_v53 = vld [vmem:[%s2037_s3 + $0x30] sm:$0xff]  ;;  %v852_v6 = vld [vmem:[%s2038_s4 + $0x20] sm:$0xff] }
 0x108   : > { %v1459_v12 = vpop.permute.xlu1 %1458  ;;  %926 = vperm.xlu2 %1491, %v860_v50  }
 0x109   : > { %v1461_v14 = vunpack.i.h.bf16 %v1459_v12  ;;  %v1460_v16 = vunpack.i.l.bf16 %v1459_v12  ;;  %v843_v17 = vpack.c.bf16 %v815_v9, %v814_v8  ;;  %891 = vperm.xlu0 %1493, %v853_v55   ;;  %v1210_v8 = vld [vmem:[%s2037_s3 + $0x38] sm:$0xff]  ;;  %v1066_v9 = vld [vmem:[%s2040_s6] sm:$0x3] }
 0x10b   : > { %v780_v21 = vmul.f32 %v1460_v16, %v1843_v23  ;;  %v781_v31 = vmul.f32 %v1461_v14, %v1843_v23  ;;  %996 = vmatpush.bf16.msra.mxu0 %v843_v17  ;;  %1258 = vmatpush.bf16.msra.mxu2 %v843_v17 }
 0x10c   : > { %1259 = vmatpush.bf16.msra.mxu3 %v843_v17 }
 0x10d   : > { %v796_v29 = vadd.f32 %v780_v21, %v699_v18  ;;  %v797_v25 = vadd.f32 %v781_v31, %v700_v19 }
 0x10f   : > { %v812_v24 = vmax.f32 %v796_v29, 0.0  ;;  %v813_v27 = vmax.f32 %v797_v25, 0.0 }
 0x110   : > { %921 = vperm.xlu2 %1491, %v859_v61  }
 0x111   : > { %v1470_v30 = vpop.permute.xlu1 %1469  ;;  %v842_v26 = vpack.c.bf16 %v813_v27, %v812_v24  ;;  %866 = vperm.xlu0 %1493, %v848_v62  }
 0x112   : > { %v1472_v35 = vunpack.i.h.bf16 %v1470_v30  ;;  %v1471_v15 = vunpack.i.l.bf16 %v1470_v30 }
 0x113   : > { %997 = vmatpush.bf16.msra.mxu0 %v842_v26  ;;  %1260 = vmatpush.bf16.msra.mxu2 %v842_v26 }
 0x114   : > { %v582_v37 = vmul.f32 %v1471_v15, %v1828_v54  ;;  %v583_v40 = vmul.f32 %v1472_v35, %v1828_v54  ;;  %1261 = vmatpush.bf16.msra.mxu3 %v842_v26  ;;  %v856_v54 = vld [vmem:[%s2038_s4 + $0x40] sm:$0xff] }
 0x115   : > { %906 = vperm.xlu1 %1492, %v856_v54  }
 0x116   : > { %v598_v42 = vadd.f32 %v582_v37, %v1783_v1  ;;  %v599_v32 = vadd.f32 %v583_v40, %v1802_v22 }
 0x117   : > { %998 = vmatpush.bf16.msra.mxu0 %v841_v59  ;;  %1262 = vmatpush.bf16.msra.mxu2 %v841_v59 }
 0x118   : > { %v695_v20 = vadd.f32 %v679_v56, %v598_v42  ;;  %v696_v11 = vadd.f32 %v680_v41, %v599_v32  ;;  %1263 = vmatpush.bf16.msra.mxu3 %v841_v59  ;;  %v1203_v59 = vld [vmem:[%s2037_s3] sm:$0xff]  ;;  %911 = vperm.xlu2 %1491, %v857_v0  }
 0x11a   : > { %v1488_v1 = vpop.permute.xlu1 %1487 }
 0x11b   : > { %v1490_v22 = vunpack.i.h.bf16 %v1488_v1  ;;  %v1489_v44 = vunpack.i.l.bf16 %v1488_v1 }
 0x11d   : > { %v776_v45 = vmul.f32 %v1489_v44, %v1843_v23  ;;  %v777_v3 = vmul.f32 %v1490_v22, %v1843_v23  ;;  %901 = vperm.xlu1 %1492, %v855_v51   ;;  %v1205_v23 = vld [vmem:[%s2037_s3 + $0x10] sm:$0xff] }
 0x11f   : > { %v792_v46 = vadd.f32 %v776_v45, %v695_v20  ;;  %v793_v47 = vadd.f32 %v777_v3, %v696_v11 }
 0x120   : > { %886 = vperm.xlu2 %1491, %v852_v6  }
 0x121   : > { %v808_v52 = vmax.f32 %v792_v46, 0.0  ;;  %v809_v57 = vmax.f32 %v793_v47, 0.0 }
 0x123   : > { %v840_v58 = vpack.c.bf16 %v809_v57, %v808_v52 }
 0x125   : > { %999 = vmatpush.bf16.msra.mxu0 %v840_v58  ;;  %1264 = vmatpush.bf16.msra.mxu2 %v840_v58 }
 0x126   : > { %1265 = vmatpush.bf16.msra.mxu3 %v840_v58  ;;  %876 = vperm.xlu1 %1492, %v850_v63  }
 0x128   : > { %1010 = vmatmul.bf16.vlgmr.msra.gmra.mxu2 %v1205_v23  ;;  %1000 = vmatmul.bf16.vlgmr.msra.gmra.mxu0 %v1203_v59 }
 0x129   : > { %1025 = vmatmul.bf16.vlgmr.msra.gmra.mxu3 %v1208_v60  ;;  %881 = vperm.xlu2 %1491, %v851_v5  }
 0x12e   : > { %871 = vperm.xlu1 %1492, %v849_v10  }
 0x131   : > { %1069 = vperm.xlu2 %1491, %v1066_v9  }
 0x138   : > { %1015 = vmatmul.bf16.gmra.mxu2 %v1206_v36  ;;  %1005 = vmatmul.bf16.gmra.mxu0 %v1204_v4 }
 0x139   : > { %1030 = vmatmul.bf16.gmra.mxu3 %v1209_v53 }
 0x148   : > { %1020 = vmatmul.bf16.gmra.mxu2 %v1207_v7 }
 0x149   : > { %1035 = vmatmul.bf16.gmra.mxu3 %v1210_v8 }
 0x15a   : > { %v937_v16 = vpop.permute.xlu2 %936 }
 0x162   : > { %v927_v38 = vpop.permute.xlu2 %926 }
 0x167   : > { %v942_v17 = vpop.permute.xlu1 %941 }
 0x16a   : > { %v922_v25 = vpop.permute.xlu2 %921 }
 0x16b   : > { %v932_v27 = vpop.permute.xlu0 %931 }
 0x16f   : > { %v917_v19 = vpop.permute.xlu1 %916 }
 0x172   : > { %v912_v30 = vpop.permute.xlu2 %911 }
 0x173   : > { %v897_v40 = vpop.permute.xlu0 %896 }
 0x17a   : > { %v887_v3 = vpop.permute.xlu2 %886 }
 0x17b   : > { %v892_v51 = vpop.permute.xlu0 %891 }
 0x183   : > { %v882_v36 = vpop.permute.xlu2 %881  ;;  %v867_v5 = vpop.permute.xlu0 %866 }
 0x187   : > { %v907_v49 = vpop.permute.xlu1 %906 }
 0x18f   : > { %v902_v37 = vpop.permute.xlu1 %901 }
 0x198   : > { %v877_v50 = vpop.permute.xlu1 %876 }
 0x1a0   : > { %v872_v8 = vpop.permute.xlu1 %871 }
 0x1a5   : > { %v1001_v29 = vpop.f32.mrf.mxu0 }
 0x1a6   : > { %v1002_v9 = vadd.f32 %v1001_v29, %v867_v5 }
 0x1ab   : > { %v1011_v34 = vpop.f32.mrf.mxu2 }
 0x1ac   : > { %v1026_v12 = vpop.f32.mrf.mxu3  ;;  %v1012_v59 = vadd.f32 %v1011_v34, %v887_v3 }
 0x1ad   : > { %v1003_v13 = vpop.f32.mrf.mxu0  ;;  %v1027_v54 = vadd.f32 %v1026_v12, %v917_v19  ;;  %v1070_v19 = vpop.permute.xlu2 %1069 }
 0x1ae   : > { %v1045_v10 = vmax.f32 %v1012_v59, 0.0 }
 0x1af   : > { %v1051_v46 = vmax.f32 %v1027_v54, 0.0 }
 0x1b3   : > { %v1013_v33 = vpop.f32.mrf.mxu2 }
 0x1b4   : > { %v1028_v14 = vpop.f32.mrf.mxu3  ;;  %v1014_v60 = vadd.f32 %v1013_v33, %v892_v51  ;;  %v1004_v33 = vadd.f32 %v1003_v13, %v872_v8 }
 0x1b5   : > { %v1029_v32 = vadd.f32 %v1028_v14, %v922_v25  ;;  %v1006_v1 = vpop.f32.mrf.mxu0 }
 0x1b6   : > { %v1046_v4 = vmax.f32 %v1014_v60, 0.0  ;;  %v1007_v53 = vadd.f32 %v1006_v1, %v877_v50 }
 0x1b7   : > { %v1052_v22 = vmax.f32 %v1029_v32, 0.0 }
 0x1b8   : > { %v1043_v12 = vmax.f32 %v1007_v53, 0.0  ;;  %v1060_v14 = vpack.c.bf16 %v1046_v4, %v1045_v10 }
 0x1b9   : > { %v1063_v58 = vpack.c.bf16 %v1052_v22, %v1051_v46 }
 0x1bb   : > { %v1016_v48 = vpop.f32.mrf.mxu2 }
 0x1bc   : > { %v1031_v18 = vpop.f32.mrf.mxu3  ;;  %v1017_v55 = vadd.f32 %v1016_v48, %v897_v40 }
 0x1bd   : > { %v1032_v56 = vadd.f32 %v1031_v18, %v927_v38  ;;  %v1008_v0 = vpop.f32.mrf.mxu0  ;;  %v1057_v38 = vld [vmem:[%s2039_s5] sm:$0x1] }
 0x1be   : > { %v1047_v61 = vmax.f32 %v1017_v55, 0.0  ;;  %v1009_v6 = vadd.f32 %v1008_v0, %v882_v36 }
 0x1bf   : > { %v1053_v2 = vmax.f32 %v1032_v56, 0.0 }
 0x1c0   : > { %v1044_v34 = vmax.f32 %v1009_v6, 0.0 }
 0x1c2   : > { %v1059_v48 = vpack.c.bf16 %v1044_v34, %v1043_v12 }
 0x1c3   : > { %v1018_v31 = vpop.f32.mrf.mxu2 }
 0x1c4   : > { %v1033_v21 = vpop.f32.mrf.mxu3  ;;  %v1019_v52 = vadd.f32 %v1018_v31, %v902_v37 }
 0x1c5   : > { %v1034_v35 = vadd.f32 %v1033_v21, %v932_v27 }
 0x1c6   : > { %v1048_v63 = vmax.f32 %v1019_v52, 0.0 }
 0x1c7   : > { %v1054_v20 = vmax.f32 %v1034_v35, 0.0 }
 0x1c8   : > { %v1061_v7 = vpack.c.bf16 %v1048_v63, %v1047_v61 }
 0x1c9   : > { %v1064_v45 = vpack.c.bf16 %v1054_v20, %v1053_v2 }
 0x1cb   : > { %v1021_v39 = vpop.f32.mrf.mxu2 }
 0x1cc   : > { %v1036_v24 = vpop.f32.mrf.mxu3  ;;  %v1022_v47 = vadd.f32 %v1021_v39, %v907_v49 }
 0x1cd   : > { %v1037_v28 = vadd.f32 %v1036_v24, %v937_v16  ;;  %v1042_v16 = vmax.f32 %v1004_v33, 0.0 }
 0x1ce   : > { %v1049_v23 = vmax.f32 %v1022_v47, 0.0 }
 0x1cf   : > { %v1055_v41 = vmax.f32 %v1037_v28, 0.0 }
 0x1d3   : > { %v1023_v43 = vpop.f32.mrf.mxu2 }
 0x1d4   : > { %v1038_v26 = vpop.f32.mrf.mxu3  ;;  %v1024_v44 = vadd.f32 %v1023_v43, %v912_v30 }
 0x1d5   : > { %v1039_v15 = vadd.f32 %v1038_v26, %v942_v17  ;;  %v1041_v17 = vmax.f32 %v1002_v9, 0.0 }
 0x1d6   : > { %v1050_v57 = vmax.f32 %v1024_v44, 0.0 }
 0x1d7   : > { %v1056_v42 = vmax.f32 %v1039_v15, 0.0  ;;  %v1058_v18 = vpack.c.bf16 %v1042_v16, %v1041_v17 }
 0x1d8   : > { %v1062_v62 = vpack.c.bf16 %v1050_v57, %v1049_v23 }
 0x1d9   : > { %v1065_v11 = vpack.c.bf16 %v1056_v42, %v1055_v41 }
 0x1db   : > { %1072 = vmatpush.bf16.msra.mxu1 %v1065_v11 }
 0x1df   : > { %1073 = vmatpush.bf16.msra.mxu1 %v1064_v45 }
 0x1e3   : > { %1074 = vmatpush.bf16.msra.mxu1 %v1063_v58 }
 0x1e7   : > { %1075 = vmatpush.bf16.msra.mxu1 %v1062_v62 }
 0x1eb   : > { %1076 = vmatpush.bf16.msra.mxu1 %v1061_v7 }
 0x1ef   : > { %1077 = vmatpush.bf16.msra.mxu1 %v1060_v14 }
 0x1f3   : > { %1078 = vmatpush.bf16.msra.mxu1 %v1059_v48 }
 0x1f7   : > { %1079 = vmatpush.bf16.msra.mxu1 %v1058_v18 }
 0x1fa   : > { %1080 = vmatmul.bf16.vlgmr.msra.gmra.mxu1 %v1057_v38 }
 0x277   : > { %v1081_v21 = vpop.f32.mrf.mxu1 }
 0x278   : > { %v1082_v31 = vadd.f32 %v1081_v21, %v1070_v19 }
 0x27a   : > { %1085 = vst [vmem:[%s269_s9] sm:$0x3] %v1082_v31 }
 0x27b   : > { %1521 = shalt.err (!%p1518_p3)
}
 0x27c   : > { %1266 = dma.vmem_to_hbm [thread:$0]  (%p1640_p5), %s1100_s13, 32, %s1102_s14, %s1087_s15  }
 0x27f   : > { %v1083_v29 = vpop.f32.mrf.mxu1 }
 0x280 PF: > { %p1272_p4 = scmp.ge.s32.totalorder %s1556_s27, 2  ;;  %s1113_s20 = sand.u32 1, %s1544_s24  }
 0x281   : > { %s1114_s23 = scalar_lea.sflag [#allocation3], %s1113_s20 }
 0x282   : > { %p1269_p7 = pnand %p1272_p4, %p1644_p6 }
 0x284   : > { %p1270_p8 = pneg %p1269_p7 }
 0x286   : > { %1539 = dma.done.wait (%p1270_p8), %s1114_s23, 32  }
 0x287   : > { %1541 = vsyncadd (%p1270_p8), %s1114_s23, 4294967264  ;;  %p17_p9 = scmp.ge.s32.totalorder %s1627_s30, 4   ;;  %s2044_s24 = smov %s1548_s25 }
 0x288   : > { %s2045_s25 = smov %s1552_s26  ;;  %s2046_s26 = smov %s1638_s10 }
 0x289   : > { %s2047_s27 = smov %s1627_s30  ;;  %19 = sbr.rel (!%p17_p9) target bundleno = 3 (0x3), region = 83 }
 0x28e   :  { %1120 = vsyncpa [#allocation3], 1 }
 0x28f   :  { %1122 = vsyncpa [#allocation3 + $0x1], 1 }

</bundles_post_ra>
